<compile_context>
chip_gen: v6e
topology: v6e:2x2x1
jax: 0.10.0
libtpu: 0.0.40
codegen_flags: <defaults>
</compile_context>

<pallas_src>
from functools import partial

import jax
import jax.numpy as jnp
from jax.experimental import pallas as pl
from jax.experimental.pallas import tpu as pltpu


def _cross_attn_kernel(x_ref, y_ref,
                       wq_ref, bq_ref, wkv_ref, bkv_ref,
                       wo_ref, bo_ref, gamma_ref, beta_ref,
                       z_ref, attn_ref,
                       *, n_heads, head_dim, eps):
    x = x_ref[0]                        # [Lq, D]
    y = y_ref[0]                        # [Lk, D]
    d_model = x.shape[-1]

    scale = 1.0 / jnp.sqrt(jnp.float32(head_dim))

    # --- fused projections (2 MXU matmuls instead of 3) ---------------------
    # Scale folded into Q once; K|V share a [D, 2D] weight (N = 2D lanes).
    # TODO(synk): at production D/L, cast matmul inputs to bf16 (f32 accum) for
    # full-rate MXU on v6e/v7x; kept f32 here for tight demo numerics.
    q = (jnp.dot(x, wq_ref[...], preferred_element_type=jnp.float32)
         + bq_ref[0]) * scale                                        # [Lq, D]
    kv = (jnp.dot(y, wkv_ref[...], preferred_element_type=jnp.float32)
          + bkv_ref[0])                                              # [Lk, 2D]

    # --- head-major stacks [H, L, hd], built once ---------------------------
    # All attention matmuls below are leading-batch dot_generals: no per-head
    # MXU pushes in a Python loop, no explicit K transpose, no concatenate of
    # per-head context columns.
    qh = jnp.stack([q[:, h * head_dim:(h + 1) * head_dim]
                    for h in range(n_heads)], axis=0)                # [H, Lq, hd]
    kh = jnp.stack([kv[:, h * head_dim:(h + 1) * head_dim]
                    for h in range(n_heads)], axis=0)                # [H, Lk, hd]
    vh = jnp.stack([kv[:, d_model + h * head_dim:d_model + (h + 1) * head_dim]
                    for h in range(n_heads)], axis=0)                # [H, Lk, hd]

    # --- scaled-dot-product attention, batched over heads -------------------
    s = jnp.einsum('hqc,hkc->hqk', qh, kh,
                   preferred_element_type=jnp.float32)               # [H, Lq, Lk]
    m = jnp.max(s, axis=-1, keepdims=True)
    e = jnp.exp(s - m)
    # EUP reciprocal (separate VLIW slot) instead of a VALU divide.
    p = e * pl.reciprocal(jnp.sum(e, axis=-1, keepdims=True), approx=True)

    attn_ref[0] = p                     # single slab store per grid step

    ctx = jnp.einsum('hqk,hkc->hqc', p, vh,
                     preferred_element_type=jnp.float32)             # [H, Lq, hd]

    # --- output projection without re-interleaving heads --------------------
    #   ctx_full @ Wo == sum_h ctx_h @ Wo[h*hd:(h+1)*hd, :]   (Wo passed [H,hd,D])
    new_x = jnp.sum(jnp.einsum('hqc,hcd->hqd', ctx, wo_ref[...],
                               preferred_element_type=jnp.float32),
                    axis=0) + bo_ref[0]                              # [Lq, D]

    # --- residual + dropout (identity at inference) + LayerNorm -------------
    # TODO(synk): training-mode dropout (p=0.1) would need pltpu.prng_*; eval
    # semantics used here.
    res = x + new_x
    mu = jnp.mean(res, axis=-1, keepdims=True)
    # Single-pass variance: E[res^2] - mu^2 (saves one full-width subtract pass).
    var = jnp.mean(res * res, axis=-1, keepdims=True) - mu * mu
    zn = (res - mu) * jax.lax.rsqrt(var + eps)
    z_ref[0] = zn * gamma_ref[0] + beta_ref[0]


def irradiance_guided_cross_attn(x, y, params, *, n_heads):
    B, Lq, D = x.shape
    _, Lk, _ = y.shape
    head_dim = D // n_heads

    # Fuse K|V projection into one [D, 2D] weight / [1, 2D] bias (wrapper-side,
    # plain XLA, free w.r.t. the kernel). Wo is passed head-major [H, hd, D].
    wkv = jnp.concatenate([params["wk"], params["wv"]], axis=1)
    bkv = jnp.concatenate([params["bk"], params["bv"]], axis=1)
    wo_h = params["wo"].reshape(n_heads, head_dim, D)

    kernel = partial(_cross_attn_kernel,
                     n_heads=n_heads, head_dim=head_dim, eps=1e-5)

    rep2 = lambda b: (0, 0)
    rep3 = lambda b: (0, 0, 0)
    in_specs = [
        pl.BlockSpec((1, Lq, D), lambda b: (b, 0, 0)),                   # x
        pl.BlockSpec((1, Lk, D), lambda b: (b, 0, 0)),                   # y
        pl.BlockSpec((D, D), rep2), pl.BlockSpec((1, D), rep2),          # Wq, bq
        pl.BlockSpec((D, 2 * D), rep2), pl.BlockSpec((1, 2 * D), rep2),  # Wkv, bkv
        pl.BlockSpec((n_heads, head_dim, D), rep3),                      # Wo (head-major)
        pl.BlockSpec((1, D), rep2),                                      # bo
        pl.BlockSpec((1, D), rep2), pl.BlockSpec((1, D), rep2),          # gamma, beta
    ]
    out_specs = (
        pl.BlockSpec((1, Lq, D), lambda b: (b, 0, 0)),
        pl.BlockSpec((1, n_heads, Lq, Lk), lambda b: (b, 0, 0, 0)),
    )
    out_shape = (
        jax.ShapeDtypeStruct((B, Lq, D), jnp.float32),
        jax.ShapeDtypeStruct((B, n_heads, Lq, Lk), jnp.float32),
    )

    return pl.pallas_call(
        kernel,
        out_shape=out_shape,
        grid=(B,),
        in_specs=in_specs,
        out_specs=out_specs,
        compiler_params=pltpu.CompilerParams(dimension_semantics=("parallel",)),
    )(x, y,
      params["wq"], params["bq"], wkv, bkv, wo_h, params["bo"],
      params["gamma"], params["beta"])


def _reference(x, y, params, *, n_heads):
    """Pure-JAX reference of the same forward pass (eval-mode dropout)."""
    B, Lq, D = x.shape
    hd = D // n_heads
    q = x @ params["wq"] + params["bq"]
    k = y @ params["wk"] + params["bk"]
    v = y @ params["wv"] + params["bv"]

    def split(t):
        Bt, Lt, _ = t.shape
        return t.reshape(Bt, Lt, n_heads, hd).transpose(0, 2, 1, 3)

    qh, kh, vh = split(q), split(k), split(v)
    s = jnp.einsum('bhqc,bhkc->bhqk', qh, kh) / jnp.sqrt(jnp.float32(hd))
    p = jax.nn.softmax(s, axis=-1)
    ctx = jnp.einsum('bhqk,bhkc->bhqc', p, vh).transpose(0, 2, 1, 3).reshape(B, Lq, D)
    new_x = ctx @ params["wo"] + params["bo"]
    res = x + new_x
    mu = res.mean(-1, keepdims=True)
    var = ((res - mu) ** 2).mean(-1, keepdims=True)
    z = (res - mu) / jnp.sqrt(var + 1e-5) * params["gamma"] + params["beta"]
    return z, p


def _init_params(key, d_model):
    ks = jax.random.split(key, 4)
    scale = 0.02

    def w(k):
        return (scale * jax.random.normal(k, (d_model, d_model))).astype(jnp.float32)

    zeros = jnp.zeros((1, d_model), jnp.float32)
    return dict(
        wq=w(ks[0]), bq=zeros,
        wk=w(ks[1]), bk=zeros,
        wv=w(ks[2]), bv=zeros,
        wo=w(ks[3]), bo=zeros,
        gamma=jnp.ones((1, d_model), jnp.float32),   # LayerNorm weight
        beta=jnp.zeros((1, d_model), jnp.float32),   # LayerNorm bias
    )


if __name__ == "__main__":
    B, Lq, Lk, D, H = 2, 8, 8, 32, 4

    key = jax.random.PRNGKey(0)
    kx, ky, kp = jax.random.split(key, 3)
    x = jax.random.normal(kx, (B, Lq, D), dtype=jnp.float32)
    y = jax.random.normal(ky, (B, Lk, D), dtype=jnp.float32)
    params = _init_params(kp, D)

    z, attn = irradiance_guided_cross_attn(x, y, params, n_heads=H)
    jax.block_until_ready((z, attn))

    assert z.shape == (B, Lq, D)
    assert attn.shape == (B, H, Lq, Lk)

    with jax.default_matmul_precision("highest"):
        z_want, attn_want = _reference(x, y, params, n_heads=H)
    assert jnp.allclose(z, z_want, atol=2e-2, rtol=2e-2)
    assert jnp.allclose(attn, attn_want, atol=2e-2, rtol=2e-2)

    print("KERNEL_OK")
</pallas_src>

<mosaic_0001>
module attributes {stable_mosaic.version = 11 : i64} {
  func.func @_cross_attn_kernel(%arg0: i32, %arg1: memref<1x8x32xf32, #tpu.memory_space<vmem>>, %arg2: memref<1x8x32xf32, #tpu.memory_space<vmem>>, %arg3: memref<32x32xf32, #tpu.memory_space<vmem>>, %arg4: memref<1x32xf32, #tpu.memory_space<vmem>>, %arg5: memref<32x64xf32, #tpu.memory_space<vmem>>, %arg6: memref<1x64xf32, #tpu.memory_space<vmem>>, %arg7: memref<4x8x32xf32, #tpu.memory_space<vmem>>, %arg8: memref<1x32xf32, #tpu.memory_space<vmem>>, %arg9: memref<1x32xf32, #tpu.memory_space<vmem>>, %arg10: memref<1x32xf32, #tpu.memory_space<vmem>>, %arg11: memref<1x8x32xf32, #tpu.memory_space<vmem>>, %arg12: memref<1x4x8x8xf32, #tpu.memory_space<vmem>>) attributes {dimension_semantics = [#tpu.dimension_semantics<parallel>], iteration_bounds = array<i64: 2>, scalar_prefetch = 0 : i64, scratch_operands = 0 : i64, tpu.core_type = #tpu.core_type<tc>, window_params = [{transform_indices = @transform_0, window_bounds = array<i64: 1, 8, 32>}, {transform_indices = @transform_1, window_bounds = array<i64: 1, 8, 32>}, {pipeline_mode = #tpu.pipeline_mode<synchronous>, transform_indices = @transform_2, window_bounds = array<i64: 32, 32>}, {pipeline_mode = #tpu.pipeline_mode<synchronous>, transform_indices = @transform_3, window_bounds = array<i64: 1, 32>}, {pipeline_mode = #tpu.pipeline_mode<synchronous>, transform_indices = @transform_4, window_bounds = array<i64: 32, 64>}, {pipeline_mode = #tpu.pipeline_mode<synchronous>, transform_indices = @transform_5, window_bounds = array<i64: 1, 64>}, {pipeline_mode = #tpu.pipeline_mode<synchronous>, transform_indices = @transform_6, window_bounds = array<i64: 4, 8, 32>}, {pipeline_mode = #tpu.pipeline_mode<synchronous>, transform_indices = @transform_7, window_bounds = array<i64: 1, 32>}, {pipeline_mode = #tpu.pipeline_mode<synchronous>, transform_indices = @transform_8, window_bounds = array<i64: 1, 32>}, {pipeline_mode = #tpu.pipeline_mode<synchronous>, transform_indices = @transform_9, window_bounds = array<i64: 1, 32>}, {transform_indices = @transform_10, window_bounds = array<i64: 1, 8, 32>}, {transform_indices = @transform_11, window_bounds = array<i64: 1, 4, 8, 8>}]} {
    %c0 = arith.constant 0 : index
    %c0_0 = arith.constant 0 : index
    %c0_1 = arith.constant 0 : index
    %0 = vector.load %arg1[%c0, %c0_0, %c0_1] : memref<1x8x32xf32, #tpu.memory_space<vmem>>, vector<1x8x32xf32>
    %1 = vector.shape_cast %0 : vector<1x8x32xf32> to vector<8x32xf32>
    %c0_2 = arith.constant 0 : index
    %c0_3 = arith.constant 0 : index
    %c0_4 = arith.constant 0 : index
    %2 = vector.load %arg2[%c0_2, %c0_3, %c0_4] : memref<1x8x32xf32, #tpu.memory_space<vmem>>, vector<1x8x32xf32>
    %3 = vector.shape_cast %2 : vector<1x8x32xf32> to vector<8x32xf32>
    %cst = arith.constant 8.000000e+00 : f32
    %4 = math.sqrt %cst : f32
    %cst_5 = arith.constant 1.000000e+00 : f32
    %5 = arith.divf %cst_5, %4 : f32
    %c0_6 = arith.constant 0 : index
    %c0_7 = arith.constant 0 : index
    %6 = vector.load %arg3[%c0_6, %c0_7] : memref<32x32xf32, #tpu.memory_space<vmem>>, vector<32x32xf32>
    %cst_8 = arith.constant dense<0.000000e+00> : vector<8x32xf32>
    %7 = tpu.matmul %1, %6, %cst_8 {dimension_numbers = #tpu.dot_dimension_numbers<[1], [0], [0], [1], [0, 0, 1, 1], [], []>} : vector<8x32xf32>, vector<32x32xf32>, vector<8x32xf32> -> vector<8x32xf32>
    %c0_9 = arith.constant 0 : index
    %c0_10 = arith.constant 0 : index
    %8 = vector.load %arg4[%c0_9, %c0_10] : memref<1x32xf32, #tpu.memory_space<vmem>>, vector<1x32xf32>
    %9 = vector.shape_cast %8 : vector<1x32xf32> to vector<32xf32>
    %10 = vector.shape_cast %9 : vector<32xf32> to vector<1x32xf32>
    %11 = vector.broadcast %10 : vector<1x32xf32> to vector<8x32xf32>
    %12 = arith.addf %7, %11 : vector<8x32xf32>
    %13 = vector.broadcast %5 : f32 to vector<8x32xf32>
    %14 = arith.mulf %12, %13 : vector<8x32xf32>
    %c0_11 = arith.constant 0 : index
    %c0_12 = arith.constant 0 : index
    %15 = vector.load %arg5[%c0_11, %c0_12] : memref<32x64xf32, #tpu.memory_space<vmem>>, vector<32x64xf32>
    %cst_13 = arith.constant dense<0.000000e+00> : vector<8x64xf32>
    %16 = tpu.matmul %3, %15, %cst_13 {dimension_numbers = #tpu.dot_dimension_numbers<[1], [0], [0], [1], [0, 0, 1, 1], [], []>} : vector<8x32xf32>, vector<32x64xf32>, vector<8x64xf32> -> vector<8x64xf32>
    %c0_14 = arith.constant 0 : index
    %c0_15 = arith.constant 0 : index
    %17 = vector.load %arg6[%c0_14, %c0_15] : memref<1x64xf32, #tpu.memory_space<vmem>>, vector<1x64xf32>
    %18 = vector.shape_cast %17 : vector<1x64xf32> to vector<64xf32>
    %19 = vector.shape_cast %18 : vector<64xf32> to vector<1x64xf32>
    %20 = vector.broadcast %19 : vector<1x64xf32> to vector<8x64xf32>
    %21 = arith.addf %16, %20 : vector<8x64xf32>
    %22 = vector.extract_strided_slice %14 {offsets = [0, 0], sizes = [8, 8], strides = [1, 1]} : vector<8x32xf32> to vector<8x8xf32>
    %23 = vector.extract_strided_slice %14 {offsets = [0, 8], sizes = [8, 8], strides = [1, 1]} : vector<8x32xf32> to vector<8x8xf32>
    %24 = vector.extract_strided_slice %14 {offsets = [0, 16], sizes = [8, 8], strides = [1, 1]} : vector<8x32xf32> to vector<8x8xf32>
    %25 = vector.extract_strided_slice %14 {offsets = [0, 24], sizes = [8, 8], strides = [1, 1]} : vector<8x32xf32> to vector<8x8xf32>
    %26 = vector.shape_cast %22 : vector<8x8xf32> to vector<1x8x8xf32>
    %27 = vector.shape_cast %23 : vector<8x8xf32> to vector<1x8x8xf32>
    %28 = vector.shape_cast %24 : vector<8x8xf32> to vector<1x8x8xf32>
    %29 = vector.shape_cast %25 : vector<8x8xf32> to vector<1x8x8xf32>
    %30 = tpu.concatenate %26, %27, %28, %29 in 0 : vector<1x8x8xf32>, vector<1x8x8xf32>, vector<1x8x8xf32>, vector<1x8x8xf32> -> vector<4x8x8xf32>
    %31 = vector.extract_strided_slice %21 {offsets = [0, 0], sizes = [8, 8], strides = [1, 1]} : vector<8x64xf32> to vector<8x8xf32>
    %32 = vector.extract_strided_slice %21 {offsets = [0, 8], sizes = [8, 8], strides = [1, 1]} : vector<8x64xf32> to vector<8x8xf32>
    %33 = vector.extract_strided_slice %21 {offsets = [0, 16], sizes = [8, 8], strides = [1, 1]} : vector<8x64xf32> to vector<8x8xf32>
    %34 = vector.extract_strided_slice %21 {offsets = [0, 24], sizes = [8, 8], strides = [1, 1]} : vector<8x64xf32> to vector<8x8xf32>
    %35 = vector.shape_cast %31 : vector<8x8xf32> to vector<1x8x8xf32>
    %36 = vector.shape_cast %32 : vector<8x8xf32> to vector<1x8x8xf32>
    %37 = vector.shape_cast %33 : vector<8x8xf32> to vector<1x8x8xf32>
    %38 = vector.shape_cast %34 : vector<8x8xf32> to vector<1x8x8xf32>
    %39 = tpu.concatenate %35, %36, %37, %38 in 0 : vector<1x8x8xf32>, vector<1x8x8xf32>, vector<1x8x8xf32>, vector<1x8x8xf32> -> vector<4x8x8xf32>
    %40 = vector.extract_strided_slice %21 {offsets = [0, 32], sizes = [8, 8], strides = [1, 1]} : vector<8x64xf32> to vector<8x8xf32>
    %41 = vector.extract_strided_slice %21 {offsets = [0, 40], sizes = [8, 8], strides = [1, 1]} : vector<8x64xf32> to vector<8x8xf32>
    %42 = vector.extract_strided_slice %21 {offsets = [0, 48], sizes = [8, 8], strides = [1, 1]} : vector<8x64xf32> to vector<8x8xf32>
    %43 = vector.extract_strided_slice %21 {offsets = [0, 56], sizes = [8, 8], strides = [1, 1]} : vector<8x64xf32> to vector<8x8xf32>
    %44 = vector.shape_cast %40 : vector<8x8xf32> to vector<1x8x8xf32>
    %45 = vector.shape_cast %41 : vector<8x8xf32> to vector<1x8x8xf32>
    %46 = vector.shape_cast %42 : vector<8x8xf32> to vector<1x8x8xf32>
    %47 = vector.shape_cast %43 : vector<8x8xf32> to vector<1x8x8xf32>
    %48 = tpu.concatenate %44, %45, %46, %47 in 0 : vector<1x8x8xf32>, vector<1x8x8xf32>, vector<1x8x8xf32>, vector<1x8x8xf32> -> vector<4x8x8xf32>
    "tpu.trace_start"() <{level = 10 : i32, message = "hqc,hkc->hqk"}> : () -> ()
    %cst_16 = arith.constant dense<0.000000e+00> : vector<4x8x8xf32>
    %49 = tpu.matmul %30, %39, %cst_16 {dimension_numbers = #tpu.dot_dimension_numbers<[2], [2], [1], [1], [0, 0, 0, 1, 1, 1], [0], [0]>} : vector<4x8x8xf32>, vector<4x8x8xf32>, vector<4x8x8xf32> -> vector<4x8x8xf32>
    "tpu.trace_stop"() : () -> ()
    %cst_17 = arith.constant dense<0xFF800000> : vector<4x8xf32>
    %50 = vector.multi_reduction <maximumf>, %49, %cst_17 [2] : vector<4x8x8xf32> to vector<4x8xf32>
    %51 = vector.shape_cast %50 : vector<4x8xf32> to vector<4x8x1xf32>
    %52 = vector.broadcast %51 : vector<4x8x1xf32> to vector<4x8x8xf32>
    %53 = arith.subf %49, %52 : vector<4x8x8xf32>
    %54 = math.exp %53 : vector<4x8x8xf32>
    %cst_18 = arith.constant dense<0.000000e+00> : vector<4x8xf32>
    %55 = vector.multi_reduction <add>, %54, %cst_18 [2] : vector<4x8x8xf32> to vector<4x8xf32>
    %56 = vector.shape_cast %55 : vector<4x8xf32> to vector<4x8x1xf32>
    %57 = tpu.reciprocal %56 {approx = true} : vector<4x8x1xf32> -> vector<4x8x1xf32>
    %58 = vector.broadcast %57 : vector<4x8x1xf32> to vector<4x8x8xf32>
    %59 = arith.mulf %54, %58 : vector<4x8x8xf32>
    %c0_19 = arith.constant 0 : index
    %c0_20 = arith.constant 0 : index
    %c0_21 = arith.constant 0 : index
    %c0_22 = arith.constant 0 : index
    %60 = vector.load %arg12[%c0_19, %c0_20, %c0_21, %c0_22] : memref<1x4x8x8xf32, #tpu.memory_space<vmem>>, vector<1x4x8x8xf32>
    %61 = vector.shape_cast %60 : vector<1x4x8x8xf32> to vector<4x8x8xf32>
    %62 = vector.shape_cast %59 : vector<4x8x8xf32> to vector<1x4x8x8xf32>
    tpu.vector_store %arg12[%c0_19, %c0_20, %c0_21, %c0_22], %62 {strides = array<i32>} : memref<1x4x8x8xf32, #tpu.memory_space<vmem>>, vector<1x4x8x8xf32>,
    "tpu.trace_start"() <{level = 10 : i32, message = "hqk,hkc->hqc"}> : () -> ()
    %cst_23 = arith.constant dense<0.000000e+00> : vector<4x8x8xf32>
    %63 = tpu.matmul %59, %48, %cst_23 {dimension_numbers = #tpu.dot_dimension_numbers<[2], [1], [1], [2], [0, 0, 0, 1, 1, 2], [0], [0]>} : vector<4x8x8xf32>, vector<4x8x8xf32>, vector<4x8x8xf32> -> vector<4x8x8xf32>
    "tpu.trace_stop"() : () -> ()
    %c0_24 = arith.constant 0 : index
    %c0_25 = arith.constant 0 : index
    %c0_26 = arith.constant 0 : index
    %64 = vector.load %arg7[%c0_24, %c0_25, %c0_26] : memref<4x8x32xf32, #tpu.memory_space<vmem>>, vector<4x8x32xf32>
    "tpu.trace_start"() <{level = 10 : i32, message = "hqc,hcd->hqd"}> : () -> ()
    %cst_27 = arith.constant dense<0.000000e+00> : vector<4x8x32xf32>
    %65 = tpu.matmul %63, %64, %cst_27 {dimension_numbers = #tpu.dot_dimension_numbers<[2], [1], [1], [2], [0, 0, 0, 1, 1, 2], [0], [0]>} : vector<4x8x8xf32>, vector<4x8x32xf32>, vector<4x8x32xf32> -> vector<4x8x32xf32>
    "tpu.trace_stop"() : () -> ()
    %cst_28 = arith.constant dense<0.000000e+00> : vector<8x32xf32>
    %66 = vector.multi_reduction <add>, %65, %cst_28 [0] : vector<4x8x32xf32> to vector<8x32xf32>
    %c0_29 = arith.constant 0 : index
    %c0_30 = arith.constant 0 : index
    %67 = vector.load %arg8[%c0_29, %c0_30] : memref<1x32xf32, #tpu.memory_space<vmem>>, vector<1x32xf32>
    %68 = vector.shape_cast %67 : vector<1x32xf32> to vector<32xf32>
    %69 = vector.shape_cast %68 : vector<32xf32> to vector<1x32xf32>
    %70 = vector.broadcast %69 : vector<1x32xf32> to vector<8x32xf32>
    %71 = arith.addf %66, %70 : vector<8x32xf32>
    %72 = arith.addf %1, %71 : vector<8x32xf32>
    %cst_31 = arith.constant dense<0.000000e+00> : vector<8xf32>
    %73 = vector.multi_reduction <add>, %72, %cst_31 [1] : vector<8x32xf32> to vector<8xf32>
    %74 = vector.shape_cast %73 : vector<8xf32> to vector<8x1xf32>
    %cst_32 = arith.constant 3.200000e+01 : f32
    %75 = vector.broadcast %cst_32 : f32 to vector<8x1xf32>
    %76 = arith.divf %74, %75 : vector<8x1xf32>
    %77 = arith.mulf %72, %72 : vector<8x32xf32>
    %cst_33 = arith.constant dense<0.000000e+00> : vector<8xf32>
    %78 = vector.multi_reduction <add>, %77, %cst_33 [1] : vector<8x32xf32> to vector<8xf32>
    %79 = vector.shape_cast %78 : vector<8xf32> to vector<8x1xf32>
    %cst_34 = arith.constant 3.200000e+01 : f32
    %80 = vector.broadcast %cst_34 : f32 to vector<8x1xf32>
    %81 = arith.divf %79, %80 : vector<8x1xf32>
    %82 = arith.mulf %76, %76 : vector<8x1xf32>
    %83 = arith.subf %81, %82 : vector<8x1xf32>
    %84 = vector.broadcast %76 : vector<8x1xf32> to vector<8x32xf32>
    %85 = arith.subf %72, %84 : vector<8x32xf32>
    %cst_35 = arith.constant 9.99999974E-6 : f32
    %86 = vector.broadcast %cst_35 : f32 to vector<8x1xf32>
    %87 = arith.addf %83, %86 : vector<8x1xf32>
    %88 = math.rsqrt %87 : vector<8x1xf32>
    %89 = vector.broadcast %88 : vector<8x1xf32> to vector<8x32xf32>
    %90 = arith.mulf %85, %89 : vector<8x32xf32>
    %c0_36 = arith.constant 0 : index
    %c0_37 = arith.constant 0 : index
    %91 = vector.load %arg9[%c0_36, %c0_37] : memref<1x32xf32, #tpu.memory_space<vmem>>, vector<1x32xf32>
    %92 = vector.shape_cast %91 : vector<1x32xf32> to vector<32xf32>
    %93 = vector.shape_cast %92 : vector<32xf32> to vector<1x32xf32>
    %94 = vector.broadcast %93 : vector<1x32xf32> to vector<8x32xf32>
    %95 = arith.mulf %90, %94 : vector<8x32xf32>
    %c0_38 = arith.constant 0 : index
    %c0_39 = arith.constant 0 : index
    %96 = vector.load %arg10[%c0_38, %c0_39] : memref<1x32xf32, #tpu.memory_space<vmem>>, vector<1x32xf32>
    %97 = vector.shape_cast %96 : vector<1x32xf32> to vector<32xf32>
    %98 = vector.shape_cast %97 : vector<32xf32> to vector<1x32xf32>
    %99 = vector.broadcast %98 : vector<1x32xf32> to vector<8x32xf32>
    %100 = arith.addf %95, %99 : vector<8x32xf32>
    %c0_40 = arith.constant 0 : index
    %c0_41 = arith.constant 0 : index
    %c0_42 = arith.constant 0 : index
    %101 = vector.load %arg11[%c0_40, %c0_41, %c0_42] : memref<1x8x32xf32, #tpu.memory_space<vmem>>, vector<1x8x32xf32>
    %102 = vector.shape_cast %101 : vector<1x8x32xf32> to vector<8x32xf32>
    %103 = vector.shape_cast %100 : vector<8x32xf32> to vector<1x8x32xf32>
    tpu.vector_store %arg11[%c0_40, %c0_41, %c0_42], %103 {strides = array<i32>} : memref<1x8x32xf32, #tpu.memory_space<vmem>>, vector<1x8x32xf32>,
    return
  }
  func.func @transform_0(%arg0: i32) -> (i32, i32, i32) {
    %c0_i32 = arith.constant 0 : i32
    %c0_i32_0 = arith.constant 0 : i32
    %c0_i32_1 = arith.constant 0 : i32
    return %arg0, %c0_i32, %c0_i32_0 : i32, i32, i32
  }
  func.func @transform_1(%arg0: i32) -> (i32, i32, i32) {
    %c0_i32 = arith.constant 0 : i32
    %c0_i32_0 = arith.constant 0 : i32
    %c0_i32_1 = arith.constant 0 : i32
    return %arg0, %c0_i32, %c0_i32_0 : i32, i32, i32
  }
  func.func @transform_2(%arg0: i32) -> (i32, i32) {
    %c0_i32 = arith.constant 0 : i32
    %c0_i32_0 = arith.constant 0 : i32
    %c0_i32_1 = arith.constant 0 : i32
    return %c0_i32, %c0_i32_0 : i32, i32
  }
  func.func @transform_3(%arg0: i32) -> (i32, i32) {
    %c0_i32 = arith.constant 0 : i32
    %c0_i32_0 = arith.constant 0 : i32
    %c0_i32_1 = arith.constant 0 : i32
    return %c0_i32, %c0_i32_0 : i32, i32
  }
  func.func @transform_4(%arg0: i32) -> (i32, i32) {
    %c0_i32 = arith.constant 0 : i32
    %c0_i32_0 = arith.constant 0 : i32
    %c0_i32_1 = arith.constant 0 : i32
    return %c0_i32, %c0_i32_0 : i32, i32
  }
  func.func @transform_5(%arg0: i32) -> (i32, i32) {
    %c0_i32 = arith.constant 0 : i32
    %c0_i32_0 = arith.constant 0 : i32
    %c0_i32_1 = arith.constant 0 : i32
    return %c0_i32, %c0_i32_0 : i32, i32
  }
  func.func @transform_6(%arg0: i32) -> (i32, i32, i32) {
    %c0_i32 = arith.constant 0 : i32
    %c0_i32_0 = arith.constant 0 : i32
    %c0_i32_1 = arith.constant 0 : i32
    %c0_i32_2 = arith.constant 0 : i32
    return %c0_i32, %c0_i32_0, %c0_i32_1 : i32, i32, i32
  }
  func.func @transform_7(%arg0: i32) -> (i32, i32) {
    %c0_i32 = arith.constant 0 : i32
    %c0_i32_0 = arith.constant 0 : i32
    %c0_i32_1 = arith.constant 0 : i32
    return %c0_i32, %c0_i32_0 : i32, i32
  }
  func.func @transform_8(%arg0: i32) -> (i32, i32) {
    %c0_i32 = arith.constant 0 : i32
    %c0_i32_0 = arith.constant 0 : i32
    %c0_i32_1 = arith.constant 0 : i32
    return %c0_i32, %c0_i32_0 : i32, i32
  }
  func.func @transform_9(%arg0: i32) -> (i32, i32) {
    %c0_i32 = arith.constant 0 : i32
    %c0_i32_0 = arith.constant 0 : i32
    %c0_i32_1 = arith.constant 0 : i32
    return %c0_i32, %c0_i32_0 : i32, i32
  }
  func.func @transform_10(%arg0: i32) -> (i32, i32, i32) {
    %c0_i32 = arith.constant 0 : i32
    %c0_i32_0 = arith.constant 0 : i32
    %c0_i32_1 = arith.constant 0 : i32
    return %arg0, %c0_i32, %c0_i32_0 : i32, i32, i32
  }
  func.func @transform_11(%arg0: i32) -> (i32, i32, i32, i32) {
    %c0_i32 = arith.constant 0 : i32
    %c0_i32_0 = arith.constant 0 : i32
    %c0_i32_1 = arith.constant 0 : i32
    %c0_i32_2 = arith.constant 0 : i32
    return %arg0, %c0_i32, %c0_i32_0, %c0_i32_1 : i32, i32, i32, i32
  }
}

</mosaic_0001>

<bundles_post_ra>
// kernel: tpu_custom_call.1
= control target key start
LH: loop header
LB: loop body
LE: loop exit
PB: predicated region body
PF: predicated region fallthrough
CT: control target
= control target key end

     0   :  { %s2840_s0 = inlined_call_operand.hbm [shape: f32[2,8,32], index: 0, kind: input, shape index: {}]   ;;  %s2841_s1 = inlined_call_operand.hbm [shape: f32[2,8,32], index: 1, kind: input, shape index: {}]   ;;  %s2842_s2 = inlined_call_operand.hbm [shape: f32[32,32], index: 2, kind: input, shape index: {}]   ;;  %s2843_s3 = inlined_call_operand.vmem [shape: f32[1,32], index: 3, kind: input, shape index: {}]   ;;  %s2844_s4 = inlined_call_operand.hbm [shape: f32[32,64], index: 4, kind: input, shape index: {}]   ;;  %s2845_s5 = inlined_call_operand.vmem [shape: f32[1,64], index: 5, kind: input, shape index: {}]   ;;  %s2846_s6 = inlined_call_operand.hbm [shape: f32[4,8,32], index: 6, kind: input, shape index: {}]   ;;  %s2847_s7 = inlined_call_operand.vmem [shape: f32[1,32], index: 7, kind: input, shape index: {}]   ;;  %s2848_s8 = inlined_call_operand.vmem [shape: f32[1,32], index: 8, kind: input, shape index: {}]   ;;  %s2849_s9 = inlined_call_operand.vmem [shape: f32[1,32], index: 9, kind: input, shape index: {}]   ;;  %s2850_s10 = inlined_call_operand.hbm [shape: f32[2,8,32], index: 10, kind: output, shape index: {0}]   ;;  %s2851_s11 = inlined_call_operand.hbm [shape: f32[2,4,8,8], index: 11, kind: output, shape index: {1}]  }
   0x1   :  { %2861 = sst [smem:[#allocation25_spill]] %s2842_s2 }
   0x2   :  { %2862 = sst [smem:[#allocation26_spill]] %s2844_s4 }
   0x3   :  { %2863 = sst [smem:[#allocation27_spill]] %s2846_s6 }
   0x4   :  { %17 = vsyncpa [#allocation3], 0 }
   0x5   :  { %19 = vsyncpa [#allocation3 + $0x1], 0 }
   0x6   :  { %20 = vsyncpa [#allocation6], 0 }
   0x7   :  { %22 = vsyncpa [#allocation6 + $0x1], 0 }
   0x8   :  { %23 = vsyncpa [#allocation9], 0 }
   0x9   :  { %24 = vsyncpa [#allocation4], 0 }
   0xa   :  { %26 = vsyncpa [#allocation4 + $0x1], 0 }
   0xb   :  { %27 = vsyncpa [#allocation13], 0 }
   0xc   :  { %29 = vsyncpa [#allocation13 + $0x1], 0  ;;  %s2460_s17 = smov 0   ;;  %s2462_s18 = smov 0  }
   0xd   :  { %s2464_s19 = smov 0   ;;  %s2466_s20 = smov 0  }
   0xe LB: > { %2864 = sst [smem:[#allocation20_spill]] %s2369_s17  ;;  %s2481_s21 = sadd.s32 4294967295, %s2381_s20   ;;  %s2381_s20 = sphi %s2466_s20, %s2890_s20   ;;  %s2377_s19 = sphi %s2464_s19, %s2895_s19   ;;  %s2373_s18 = sphi %s2462_s18, %s2894_s18   ;;  %s2369_s17 = sphi %s2460_s17, %s2893_s17  }
   0xf   : > { %2865 = sst [smem:[#allocation21_spill]] %s2377_s19  ;;  %s1861_s22 = sadd.s32 4294967294, %s2381_s20  }
  0x10   : > { %p55_p0 = scmp.ne.s32.totalorder %s2373_s18, %s2369_s17  ;;  %p2852_p1 = scmp.eq.s32.totalorder %s2481_s21, 0 }
  0x11   : > { %p279_p3 = scmp.eq.s32.totalorder %s1861_s22, 1  ;;  %p1862_p5 = scmp.ge.s32.totalorder %s2381_s20, 1 }
  0x12   : > { %p2490_p4 = por %p2852_p1, %p55_p0  ;;  %p312_p7 = scmp.lt.s32.totalorder %s2381_s20, 3 }
  0x13   : > { %p2495_p6 = por %p279_p3, %p55_p0  ;;  %s2383_s26 = smov [#allocation7]  }
  0x14   : > { %s2866_s23 = scalar_select %p2490_p4, 1, 0 }
  0x15   : > { %s2867_s24 = scalar_select %p2495_p6, 1, 0 }
  0x16   : > { %p2500_p8 = pnand %p1862_p5, %p312_p7  ;;  %s324_s27 = sshll.u32 %s2383_s26, 4  ;;  %s325_s27 = int_to_ptr.vmem [resolvable:$true] %s324_s27 }
  0x17   : > { %2868 = sst [smem:[#allocation22_spill]] %s2867_s24  ;;  %s2384_s29 = smov [#allocation8]  }
  0x18   : > { %s2869_s25 = scalar_select %p2500_p8, 1, 0 }
  0x19   : > { %p2046_p9 = pneg %p2500_p8  ;;  %s340_s30 = sshll.u32 %s2384_s29, 4  ;;  %s341_s30 = int_to_ptr.vmem [resolvable:$true] %s340_s30 }
  0x1a   : > { %s2385_s12 = smov [#allocation10]   ;;  %s2152_s14 = scalar_lea.vmem %s325_s27, 512 }
  0x1b   : > { %p2509_p11 = pnand %p2046_p9, %p2852_p1  ;;  %s356_s13 = sshll.u32 %s2385_s12, 4  ;;  %s357_s13 = int_to_ptr.vmem [resolvable:$true] %s356_s13 }
  0x1c   : > { %p2153_p13 = scmp.ne.s32.totalorder %s325_s27, %s2152_s14  ;;  %p2160_p5 = scmp.lt.s32.totalorder %s325_s27, %s325_s27 }
  0x1d   : > { %p2143_p12 = pneg %p2509_p11  ;;  %p2161_p7 = scmp.lt.s32.totalorder %s2152_s14, %s2152_s14 }
  0x1f   : > { %p2155_p0 = pnand %p2153_p13, %p2143_p12  ;;  %p2162_p9 = por %p2161_p7, %p2160_p5 }
  0x21   : > { %p2156_p3 = pneg %p2155_p0 }
  0x23   : > { %p2163_p10 = pnand %p2162_p9, %p2156_p3 }
  0x25   : > { %2166 = shalt.err (!%p2163_p10)
}
  0x26   : > { %s2386_s15 = smov 128   ;;  %s2387_s16 = smov 8  }
  0x27   : > { %s2871_s2 = sld [smem:[#allocation25_spill]]  ;;  %s2178_s29 = scalar_lea.vmem %s341_s30, 512 }
  0x28   : > { %p2179_p1 = scmp.ne.s32.totalorder %s341_s30, %s2178_s29  ;;  %p2186_p2 = scmp.lt.s32.totalorder %s341_s30, %s341_s30 }
  0x29   : > { %p2187_p6 = scmp.lt.s32.totalorder %s2178_s29, %s2178_s29 }
  0x2a   : > { %p2181_p13 = pnand %p2179_p1, %p2143_p12 }
  0x2b   : > { %p2188_p5 = por %p2187_p6, %p2186_p2 }
  0x2c   : > { %p2182_p0 = pneg %p2181_p13 }
  0x2d   : > { %2049 = dma.hbm_to_vmem [thread:$0]  (!%p2509_p11), %s2871_s2, 512, %s325_s27, [#allocation6], %s2386_s15, %s2386_s15, %s2387_s16  }
  0x2e   : > { %p2189_p3 = pnand %p2188_p5, %p2182_p0 }
  0x30   : > { %2192 = shalt.err (!%p2189_p3)
}
  0x31   : > { %s2872_s4 = sld [smem:[#allocation26_spill]]  ;;  %s2204_s27 = scalar_lea.vmem %s357_s13, 512 }
  0x32   : > { %p2205_p10 = scmp.ne.s32.totalorder %s357_s13, %s2204_s27  ;;  %p2212_p9 = scmp.lt.s32.totalorder %s357_s13, %s357_s13 }
  0x33   : > { %p2213_p13 = scmp.lt.s32.totalorder %s2204_s27, %s2204_s27 }
  0x34   : > { %p2207_p7 = pnand %p2205_p10, %p2143_p12 }
  0x35   : > { %p2214_p4 = por %p2213_p13, %p2212_p9 }
  0x36   : > { %p2208_p1 = pneg %p2207_p7 }
  0x37   : > { %2052 = dma.hbm_to_vmem [thread:$0]  (!%p2509_p11), %s2872_s4, 512, %s341_s30, [#allocation9], %s2386_s15, %s2386_s15, %s2387_s16  }
  0x38   : > { %p2215_p2 = pnand %p2214_p4, %p2208_p1 }
  0x3a   : > { %2218 = shalt.err (!%p2215_p2)
}
  0x3b   : > { %s2873_s6 = sld [smem:[#allocation27_spill]]  ;;  %s2540_s30 = sadd.s32 1, %s2381_s20  }
  0x3c   : > { %2874 = sst [smem:[#allocation23_spill]] %s2540_s30  ;;  %s39_s29 = ssub.s32 %s2381_s20, %s2540_s30 }
  0x3d   : > { %s42_s28 = sadd.s32 1, %s2377_s19  ;;  %p40_p4 = scmp.eq.s32.totalorder %s39_s29, 0 }
  0x3e   : > { %p49_p6 = scmp.ne.s32.totalorder %s2377_s19, %s2373_s18  ;;  %p50_p12 = scmp.eq.s32.totalorder %s2381_s20, 0 }
  0x3f   : > { %p2073_p0 = scmp.lt.s32.totalorder %s2381_s20, 2  ;;  %p2876_p3 = scmp.eq.s32.totalorder %s2481_s21, 1 }
  0x40   : > { %s2550_s12 = scalar_select %p40_p4, %s2377_s19, %s42_s28  }
  0x41   : > { %2055 = dma.hbm_to_vmem [thread:$0]  (!%p2509_p11), %s2873_s6, 512, %s357_s13, [#allocation9], %s2386_s15, %s2386_s15, %s2387_s16  }
  0x42   : > { %2875 = sst [smem:[#allocation24_spill]] %s2550_s12  ;;  %p51_p5 = por %p50_p12, %p49_p6 }
  0x43   : > { %p2554_p10 = por %p2876_p3, %p49_p6  ;;  %s379_s27 = sand.u32 1, %s2377_s19  }
  0x44   : > { %s1868_s22 = sshll.u32 %s2381_s20, 7  ;;  %s2560_s13 = sshll.u32 %s379_s27, 3 }
  0x45   : > { %s2877_s14 = scalar_select %p2554_p10, 1, 0 }
  0x46   : > { %s2565_s26 = scalar_lea.hbm %s2840_s0, %s1868_s22  ;;  %s383_s29 = scalar_lea.vmem [#allocation2], %s2560_s13 }
  0x47   : > { %s390_s28 = sshll.u32 %s383_s29, 4  ;;  %p2568_p11 = pnand %p2073_p0, %p51_p5  ;;  %s391_s28 = int_to_ptr.vmem [resolvable:$true] %s390_s28 }
  0x48   : > { %s2575_s12 = scalar_lea.hbm %s2841_s1, %s1868_s22  ;;  %s380_s15 = scalar_lea.sflag [#allocation3], %s379_s27 }
  0x49   : > { %s2219_s16 = scalar_lea.hbm %s2565_s26, 128  ;;  %p2221_p1 = pneg %p2568_p11 }
  0x4a   : > { %p2220_p7 = scmp.ne.s32.totalorder %s2565_s26, %s2219_s16  ;;  %s2224_s30 = scalar_lea.hbm %s2840_s0, 256 }
  0x4b   : > { %p2225_p2 = scmp.lt.s32.totalorder %s2565_s26, %s2840_s0  ;;  %p2226_p4 = scmp.lt.s32.totalorder %s2224_s30, %s2219_s16 }
  0x4c   : > { %p2222_p9 = pnand %p2221_p1, %p2220_p7 }
  0x4d   : > { %p2227_p6 = por %p2226_p4, %p2225_p2 }
  0x4e   : > { %p2223_p13 = pneg %p2222_p9 }
  0x50   : > { %p2228_p12 = pnand %p2227_p6, %p2223_p13 }
  0x52   : > { %2231 = shalt.err (!%p2228_p12)
}
  0x53   : > { %s2232_s4 = scalar_lea.vmem %s391_s28, 128  ;;  %s2388_s6 = smov [#allocation2]  }
  0x54   : > { %p2233_p0 = scmp.ne.s32.totalorder %s391_s28, %s2232_s4  ;;  %s2237_s27 = sshll.u32 %s2388_s6, 4  ;;  %s2238_s27 = int_to_ptr.vmem [resolvable:$false] %s2237_s27 }
  0x55   : > { %s2239_s19 = scalar_lea.vmem %s2238_s27, 256  ;;  %p2240_p7 = scmp.lt.s32.totalorder %s391_s28, %s2238_s27 }
  0x56   : > { %p2235_p5 = pnand %p2233_p0, %p2221_p1  ;;  %p2241_p9 = scmp.lt.s32.totalorder %s2239_s19, %s2232_s4 }
  0x58   : > { %p2236_p3 = pneg %p2235_p5  ;;  %p2242_p10 = por %p2241_p9, %p2240_p7 }
  0x5a   : > { %p2243_p8 = pnand %p2242_p10, %p2236_p3 }
  0x5c   : > { %2246 = shalt.err (!%p2243_p8)
}
  0x5d   : > { %2059 = dma.hbm_to_vmem [thread:$0]  (!%p2568_p11), %s2565_s26, 128, %s391_s28, %s380_s15  }
  0x5e   : > { %s397_s17 = sand.u32 1, %s2381_s20   ;;  %s401_s24 = scalar_lea.vmem [#allocation5], %s2560_s13 }
  0x5f   : > { %s408_s30 = sshll.u32 %s401_s24, 4  ;;  %s398_s22 = scalar_lea.sflag [#allocation6], %s397_s17  ;;  %s409_s30 = int_to_ptr.vmem [resolvable:$true] %s408_s30 }
  0x60   : > { %s2247_s16 = scalar_lea.hbm %s2575_s12, 128  ;;  %s2252_s6 = scalar_lea.hbm %s2841_s1, 256 }
  0x61   : > { %p2248_p13 = scmp.ne.s32.totalorder %s2575_s12, %s2247_s16  ;;  %p2253_p2 = scmp.lt.s32.totalorder %s2575_s12, %s2841_s1 }
  0x62   : > { %p2254_p4 = scmp.lt.s32.totalorder %s2252_s6, %s2247_s16 }
  0x63   : > { %p2250_p8 = pnand %p2248_p13, %p2221_p1 }
  0x64   : > { %p2255_p6 = por %p2254_p4, %p2253_p2 }
  0x65   : > { %p2251_p10 = pneg %p2250_p8 }
  0x67   : > { %p2256_p12 = pnand %p2255_p6, %p2251_p10 }
  0x69   : > { %2259 = shalt.err (!%p2256_p12)
}
  0x6a   : > { %s2260_s13 = scalar_lea.vmem %s409_s30, 128  ;;  %s2389_s26 = smov [#allocation5]  }
  0x6b   : > { %p2261_p0 = scmp.ne.s32.totalorder %s409_s30, %s2260_s13  ;;  %s2265_s28 = sshll.u32 %s2389_s26, 4  ;;  %s2266_s28 = int_to_ptr.vmem [resolvable:$false] %s2265_s28 }
  0x6c   : > { %s2267_s15 = scalar_lea.vmem %s2266_s28, 256  ;;  %p2268_p7 = scmp.lt.s32.totalorder %s409_s30, %s2266_s28 }
  0x6d   : > { %p2263_p5 = pnand %p2261_p0, %p2221_p1  ;;  %p2269_p9 = scmp.lt.s32.totalorder %s2267_s15, %s2260_s13 }
  0x6f   : > { %p2264_p3 = pneg %p2263_p5  ;;  %p2270_p13 = por %p2269_p9, %p2268_p7 }
  0x71   : > { %p2271_p8 = pnand %p2270_p13, %p2264_p3 }
  0x73   : > { %2274 = shalt.err (!%p2271_p8)
}
  0x74   : > { %2062 = dma.hbm_to_vmem [thread:$0]  (!%p2568_p11), %s2575_s12, 128, %s409_s30, %s398_s22  }
  0x75   : > { %p2879_p10 = scmp.ne.s32.totalorder %s2869_s25, 0 }
  0x76   : > { %s2620_s17 = sand.u32 (!%p2879_p10), 1, %s2373_s18   ;;  %p2880_p1 = scmp.ne.s32.totalorder (!%p2879_p10), %s2866_s23, 0 }
  0x77   : > { %417 = sbr.rel (%p2879_p10) target bundleno = 1545 (0x609), region = 60  ;;  %s2623_s24 = sshll.u32 (!%p2879_p10), %s2620_s17, 3 }
  0x78   : > { %s420_s16 = scalar_lea.sflag (!%p2879_p10), [#allocation3], %s2620_s17  ;;  %s423_s29 = scalar_lea.vmem (!%p2879_p10), [#allocation2], %s2623_s24 }
  0x7c   : > { %2344 = dma.done.wait (%p2880_p1), %s420_s16, 128  }
  0x7d   : > { %2346 = vsyncadd (%p2880_p1), %s420_s16, 4294967168  ;;  %s428_s2 = sand.u32 1, %s2481_s21   ;;  %s432_s12 = scalar_lea.vmem [#allocation5], %s2623_s24 }
  0x7e   : > { %s429_s25 = scalar_lea.sflag [#allocation6], %s428_s2 }
  0x7f   : > { %2348 = dma.done.wait (%p2880_p1), %s429_s25, 128  }
  0x80   : > { %2350 = vsyncadd (%p2880_p1), %s429_s25, 4294967168  ;;  %p2881_p11 = scmp.eq.s32.totalorder %s2481_s21, 0 }
  0x82   : > { %2352 = dma.done.wait (%p2881_p11), [#allocation6], 512   ;;  %p2882_p2 = pmov %p2881_p11 }
  0x84   : > { %2354 = vsyncadd (%p2882_p2), [#allocation6], 4294966784  ;;  %p2883_p4 = pmov %p2882_p2 }
  0x85   : > { %p2884_p6 = pmov %p2882_p2 }
  0x86   : > { %2356 = dma.done.wait (%p2883_p4), [#allocation9], 1024  }
  0x87   : > { %2358 = vsyncadd (%p2884_p6), [#allocation9], 4294966272  ;;  %v2390_v0 = vmov 0.0   ;;  %vm2391_vm0 = vmmov 0   ;;  %v584_v1 = vld [vmem:[#allocation8 + $0x18] sm:$0xff]  ;;  %v583_v3 = vld [vmem:[#allocation8 + $0x10] sm:$0xff] }
  0x88   : > { %1955 = vmatprep.subr.mxu1 %v2390_v0  ;;  %1944 = vmatprep.subr.mxu0 %v2390_v0  ;;  %v498_v2 = vld [vmem:[#allocation7 + $0x18] sm:$0xff]  ;;  %v497_v4 = vld [vmem:[#allocation7 + $0x10] sm:$0xff]  ;;  %v582_v5 = vld [vmem:[#allocation8 + $0x8] sm:$0xff]  ;;  %vm506_vm1 = vcmask 261120   ;;  %vm679_vm2 = vcmask 64512   ;;  %s2392_s6 = smov 104  }
  0x89   : > { %1963 = vmatprep.mubr.msk.f32.mxu1 %vm2391_vm0, %v2390_v0  ;;  %1952 = vmatprep.mubr.msk.f32.mxu0 %vm2391_vm0, %v2390_v0  ;;  %v496_v6 = vld [vmem:[#allocation7 + $0x8] sm:$0xff]  ;;  %v581_v7 = vld [vmem:[#allocation8] sm:$0xff]  ;;  %v494_v9 = vld [vmem:[%s432_s12] sm:$0xff]  ;;  %s2393_s27 = smov 120   ;;  %s2394_s19 = smov 112  }
  0x8a   : > { %1956 = vmatpush3.msra.mxu1 %v584_v1  ;;  %1945 = vmatpush3.msra.mxu0 %v498_v2  ;;  %v495_v8 = vld [vmem:[#allocation7] sm:$0xff]  ;;  %s2395_s13 = smov 96   ;;  %s1878_s26 = sshll.u32 %s2620_s17, 5 }
  0x8b   : > { %1957 = vmatprep.subr.mxu1 %v2390_v0  ;;  %1946 = vmatprep.subr.mxu0 %v2390_v0  ;;  %v2659_v10 = vld [vmem:[%s423_s29] sm:$0xff]  ;;  %s2720_s28 = scalar_lea.vmem [#allocation12], %s1878_s26  ;;  %s1909_s29 = sshll.u32 %s2481_s21, 9 }
  0x8c   : > { %1958 = vmatpush3.msra.mxu1 %v583_v3  ;;  %1947 = vmatpush3.msra.mxu0 %v497_v4  ;;  %v1881_v11 = vld [vmem:[%s2845_s5] ss:$0 sm:$0xff]  ;;  %s1705_s2 = sshll.u32 %s2720_s28, 4  ;;  %s2770_s23 = scalar_lea.hbm %s2851_s11, %s1909_s29  ;;  %s2772_s2 = int_to_ptr.vmem [resolvable:$true] %s1705_s2 }
  0x8d   : > { %1959 = vmatprep.subr.mxu1 %v2390_v0  ;;  %1948 = vmatprep.subr.mxu0 %v2390_v0  ;;  %v1879_v12 = vld [vmem:[%s2843_s3] ss:$0 sm:$0xff]  ;;  %s1679_s30 = scalar_lea.sflag [#allocation13], %s2620_s17  ;;  %s2275_s22 = scalar_lea.vmem %s2772_s2, 512 }
  0x8e   : > { %1960 = vmatpush3.msra.mxu1 %v582_v5  ;;  %1949 = vmatpush3.msra.mxu0 %v496_v6  ;;  %p2276_p12 = scmp.ne.s32.totalorder %s2772_s2, %s2275_s22  ;;  %p2885_p0 = scmp.ne.s32.totalorder %s2877_s14, 0 }
  0x8f   : > { %1961 = vmatprep.subr.mxu1 %v2390_v0  ;;  %1950 = vmatprep.subr.mxu0 %v2390_v0  ;;  %s2396_s4 = smov [#allocation12]  }
  0x90   : > { %1962 = vmatpush3.msra.mxu1 %v581_v7  ;;  %1951 = vmatpush3.msra.mxu0 %v495_v8  ;;  %p2277_p5 = pnand %p2276_p12, %p2885_p0 }
  0x91   : > { %1964 = vmatmul.mubr.msk.f32.vlgmr.msra.gmra.mxu1 %vm506_vm1, %v494_v9  ;;  %1953 = vmatmul.mubr.msk.f32.vlgmr.msra.gmra.mxu0 %vm506_vm1, %v2659_v10  ;;  %v1328_v9 = vld [vmem:[#allocation10] sm:$0xff] }
  0x92   : > { %1966 = vmatprep.subr.mxu0 %v2390_v0  ;;  %1968 = vmatprep.mubr.msk.f32.mxu0 %vm2391_vm0, %v2390_v0  ;;  %p2278_p3 = pneg %p2277_p5 }
  0x93   : > { %1971 = vmatprep.subr.mxu1 %v2390_v0  ;;  %1973 = vmatprep.mubr.msk.f32.mxu1 %vm2391_vm0, %v2390_v0 }
 0x151   : > { %v661_v13 = vpop.f32.mrf.mxu1  ;;  %v576_v14 = vpop.f32.mrf.mxu0 }
 0x152   : > { %v662_v15 = vadd.f32 %v1881_v11, %v661_v13  ;;  %v577_v16 = vadd.f32 %v1879_v12, %v576_v14  ;;  %v1329_v13 = vld [vmem:[#allocation10 + $0x8] sm:$0xff]  ;;  %v1330_v14 = vld [vmem:[#allocation10 + $0x10] sm:$0xff] }
 0x153   : > { %v1965_v17 = vpop.f32.mrf.mxu1  ;;  %v1954_v18 = vpop.f32.mrf.mxu0 }
 0x154   : > { %v580_v19 = vmul.f32 0.35355338, %v577_v16  ;;  %677 = vrot.lane.b32.xlu1 %v662_v15, %s2392_s6  ;;  %673 = vrot.lane.b32.xlu0 %v662_v15, %s2393_s27  ;;  %v1331_v17 = vld [vmem:[#allocation10 + $0x18] sm:$0xff] }
 0x155   : > { %1967 = vmatpush3.xpose.msk.msra.mxu0 %vm679_vm2, %v662_v15 }
 0x156   : > { %1976 = vmatprep.subr.mxu0 %v2390_v0 }
 0x158   : > { %1969 = vmatmul.mubr.msk.f32.vlgmr.msra.gmra.mxu0 %vm679_vm2, %v580_v19  ;;  %675 = vrot.lane.b32.xlu0 %v662_v15, %s2394_s19 }
 0x159   : > { %666 = vrot.lane.b32.xlu1 %v580_v19, %s2393_s27  ;;  %1978 = vmatprep.mubr.msk.f32.mxu0 %vm2391_vm0, %v2390_v0 }
 0x15c   : > { %668 = vrot.lane.b32.xlu0 %v580_v19, %s2394_s19 }
 0x15d   : > { %670 = vrot.lane.b32.xlu1 %v580_v19, %s2392_s6  ;;  %s2279_s6 = sshll.u32 %s2396_s4, 4  ;;  %s2280_s6 = int_to_ptr.vmem [resolvable:$false] %s2279_s6 }
 0x15e   : > { %s2281_s27 = scalar_lea.vmem %s2280_s6, 1024  ;;  %p2282_p7 = scmp.lt.s32.totalorder %s2772_s2, %s2280_s6 }
 0x15f   : > { %p2283_p9 = scmp.lt.s32.totalorder %s2281_s27, %s2275_s22 }
 0x161   : > { %p2284_p13 = por %p2283_p9, %p2282_p7 }
 0x163   : > { %p2285_p8 = pnand %p2284_p13, %p2278_p3 }
 0x1c6   : > { %v2683_v20 = vpop.permute.xlu1 %677  ;;  %v2685_v21 = vpop.permute.xlu0 %673 }
 0x1c7   : > { %1972 = vmatpush3.xpose.msk.msra.mxu1 %vm679_vm2, %v2685_v21 }
 0x1c8   : > { %1981 = vmatprep.subr.mxu1 %v2390_v0 }
 0x1ca   : > { %v676_v22 = vpop.permute.xlu0 %675 }
 0x1cb   : > { %v667_v23 = vpop.permute.xlu1 %666  ;;  %1977 = vmatpush3.xpose.msk.msra.mxu0 %vm679_vm2, %v676_v22 }
 0x1cc   : > { %1974 = vmatmul.mubr.msk.f32.vlgmr.msra.gmra.mxu1 %vm679_vm2, %v667_v23  ;;  %1986 = vmatprep.subr.mxu0 %v2390_v0 }
 0x1cd   : > { %1982 = vmatpush3.xpose.msk.msra.mxu1 %vm679_vm2, %v2683_v20  ;;  %1983 = vmatprep.mubr.msk.f32.mxu1 %vm2391_vm0, %v2390_v0 }
 0x1ce   : > { %v669_v24 = vpop.permute.xlu0 %668  ;;  %1991 = vmatprep.subr.mxu1 %v2390_v0 }
 0x1cf   : > { %v671_v25 = vpop.permute.xlu1 %670  ;;  %1979 = vmatmul.mubr.msk.f32.vlgmr.msra.gmra.mxu0 %vm679_vm2, %v669_v24 }
 0x1d0   : > { %1984 = vmatmul.mubr.msk.f32.vlgmr.msra.gmra.mxu1 %vm679_vm2, %v671_v25  ;;  %1988 = vmatprep.mubr.msk.f32.mxu0 %vm2391_vm0, %v2390_v0 }
 0x1d1   : > { %1993 = vmatprep.mubr.msk.f32.mxu1 %vm2391_vm0, %v2390_v0 }
 0x218   : > { %v750_v26 = vpop.f32.mrf.mxu0 }
 0x219   : > { %v976_v27 = vsel %vm679_vm2, %v750_v26, -inf }
 0x21a   : > { %977 = vmax.xlane.f32.xlu0 %v976_v27  ;;  %v1970_v28 = vpop.f32.mrf.mxu0 }
 0x28c   : > { %v824_v29 = vpop.f32.mrf.mxu1 }
 0x28d   : > { %v979_v30 = vsel %vm679_vm2, %v824_v29, -inf }
 0x28e   : > { %980 = vmax.xlane.f32.xlu1 %v979_v30  ;;  %v1975_v31 = vpop.f32.mrf.mxu1 }
 0x28f   : > { %v898_v32 = vpop.f32.mrf.mxu0 }
 0x290   : > { %v972_v33 = vpop.f32.mrf.mxu1  ;;  %v982_v34 = vsel %vm679_vm2, %v898_v32, -inf }
 0x291   : > { %983 = vmax.xlane.f32.xlu0 %v982_v34  ;;  %v1980_v35 = vpop.f32.mrf.mxu0  ;;  %v985_v37 = vsel %vm679_vm2, %v972_v33, -inf }
 0x292   : > { %v1985_v36 = vpop.f32.mrf.mxu1 }
 0x293   : > { %v1899_v36 = vld [vmem:[%s2847_s7] ss:$0 sm:$0xff] }
 0x295   : > { %986 = vmax.xlane.f32.xlu0 %v985_v37 }
 0x29f   : > { %1024 = vrot.lane.b32.xlu1 %v662_v15, %s2395_s13 }
 0x2a3   : > { %v978_v38 = vpop.xlane.xlu0 %977 }
 0x2a4   : > { %v988_v39 = vsub.f32 %v750_v26, %v978_v38 }
 0x2a6   : > { %v992_v40 = vmul.f32 1.442695, %v988_v39 }
 0x2a8   : > { %2123 = vpow2.f32 %v992_v40 }
 0x2b5   : > { %v2124_v41 = vpop.eup %2123 }
 0x2b6   : > { %v1000_v42 = vsel %vm679_vm2, %v2124_v41, 0.0 }
 0x2c3   : > { %1001 = vadd.xlane.f32.xlu1 %v1000_v42 }
 0x317   : > { %v981_v43 = vpop.xlane.xlu1 %980 }
 0x318   : > { %v989_v44 = vsub.f32 %v824_v29, %v981_v43 }
 0x31a   : > { %v994_v45 = vmul.f32 1.442695, %v989_v44  ;;  %v984_v46 = vpop.xlane.xlu0 %983 }
 0x31b   : > { %v1025_v47 = vpop.permute.xlu1 %1024  ;;  %v990_v48 = vsub.f32 %v898_v32, %v984_v46 }
 0x31c   : > { %2125 = vpow2.f32 %v994_v45  ;;  %1987 = vmatpush3.msra.mxu0 %v1025_v47 }
 0x31d   : > { %v996_v49 = vmul.f32 1.442695, %v990_v48  ;;  %1996 = vmatprep.subr.mxu0 %v2390_v0 }
 0x31e   : > { %v987_v50 = vpop.xlane.xlu0 %986 }
 0x31f   : > { %2127 = vpow2.f32 %v996_v49  ;;  %v991_v51 = vsub.f32 %v972_v33, %v987_v50 }
 0x321   : > { %v998_v52 = vmul.f32 1.442695, %v991_v51 }
 0x323   : > { %2129 = vpow2.f32 %v998_v52 }
 0x329   : > { %v2126_v53 = vpop.eup %2125 }
 0x32a   : > { %v1003_v54 = vsel %vm679_vm2, %v2126_v53, 0.0 }
 0x32b   : > { %1004 = vadd.xlane.f32.xlu0 %v1003_v54 }
 0x32c   : > { %v2128_v55 = vpop.eup %2127 }
 0x32d   : > { %v1006_v56 = vsel %vm679_vm2, %v2128_v55, 0.0 }
 0x32e   : > { %1007 = vadd.xlane.f32.xlu1 %v1006_v56 }
 0x330   : > { %v2130_v57 = vpop.eup %2129 }
 0x331   : > { %v1009_v58 = vsel %vm679_vm2, %v2130_v57, 0.0 }
 0x332   : > { %1010 = vadd.xlane.f32.xlu0 %v1009_v58 }
 0x33f   : > { %1176 = vrot.lane.b32.xlu1 %v676_v22, %s2395_s13 }
 0x343   : > { %1252 = vrot.lane.b32.xlu1 %v2683_v20, %s2395_s13 }
 0x348   : > { %1100 = vrot.lane.b32.xlu0 %v2685_v21, %s2395_s13 }
 0x34c   : > { %v1002_v59 = vpop.xlane.xlu1 %1001 }
 0x34d   : > { %2131 = vrcp.f32 %v1002_v59 }
 0x35a   : > { %v2132_v60 = vpop.eup %2131 }
 0x35b   : > { %v1016_v61 = vmul.f32 %v2132_v60, %v2124_v41 }
 0x35d   : > { %1020 = vst.msk [vmem:[%s2720_s28] sm:$0xff] %vm679_vm2, %v1016_v61  ;;  %1989 = vmatmul.mubr.msk.f32.vlgmr.msra.gmra.mxu0 %vm679_vm2, %v1016_v61 }
 0x35e   : > { %1998 = vmatprep.mubr.msk.f32.mxu0 %vm2391_vm0, %v2390_v0 }
 0x3b4   : > { %v1005_v62 = vpop.xlane.xlu0 %1004 }
 0x3b5   : > { %2133 = vrcp.f32 %v1005_v62 }
 0x3b7   : > { %v1008_v63 = vpop.xlane.xlu1 %1007 }
 0x3b8   : > { %2135 = vrcp.f32 %v1008_v63 }
 0x3bb   : > { %v1177_v1 = vpop.permute.xlu1 %1176  ;;  %v1011_v2 = vpop.xlane.xlu0 %1010 }
 0x3bc   : > { %2137 = vrcp.f32 %v1011_v2  ;;  %1997 = vmatpush3.msra.mxu0 %v1177_v1 }
 0x3bd   : > { %2006 = vmatprep.subr.mxu0 %v2390_v0 }
 0x3bf   : > { %v1101_v3 = vpop.permute.xlu0 %1100  ;;  %v1253_v7 = vpop.permute.xlu1 %1252 }
 0x3c0   : > { %1992 = vmatpush3.msra.mxu1 %v1101_v3 }
 0x3c1   : > { %2001 = vmatprep.subr.mxu1 %v2390_v0 }
 0x3c2   : > { %v2134_v4 = vpop.eup %2133 }
 0x3c3   : > { %v1017_v5 = vmul.f32 %v2134_v4, %v2126_v53 }
 0x3c5   : > { %v2136_v6 = vpop.eup %2135  ;;  %1021 = vst.msk [vmem:[%s2720_s28 + $0x8] sm:$0xff] %vm679_vm2, %v1017_v5  ;;  %1994 = vmatmul.mubr.msk.f32.vlgmr.msra.gmra.mxu1 %vm679_vm2, %v1017_v5 }
 0x3c6   : > { %2002 = vmatpush3.msra.mxu1 %v1253_v7  ;;  %v1018_v8 = vmul.f32 %v2136_v6, %v2128_v55  ;;  %2003 = vmatprep.mubr.msk.f32.mxu1 %vm2391_vm0, %v2390_v0 }
 0x3c7   : > { %2011 = vmatprep.subr.mxu1 %v2390_v0 }
 0x3c8   : > { %1022 = vst.msk [vmem:[%s2720_s28 + $0x10] sm:$0xff] %vm679_vm2, %v1018_v8  ;;  %1999 = vmatmul.mubr.msk.f32.vlgmr.msra.gmra.mxu0 %vm679_vm2, %v1018_v8 }
 0x3c9   : > { %v2138_v11 = vpop.eup %2137  ;;  %2007 = vmatpush3.msra.mxu0 %v1328_v9  ;;  %2008 = vmatprep.mubr.msk.f32.mxu0 %vm2391_vm0, %v2390_v0 }
 0x3ca   : > { %v1019_v12 = vmul.f32 %v2138_v11, %v2130_v57  ;;  %2016 = vmatprep.subr.mxu0 %v2390_v0 }
 0x3cc   : > { %1023 = vst.msk [vmem:[%s2720_s28 + $0x18] sm:$0xff] %vm679_vm2, %v1019_v12  ;;  %2004 = vmatmul.mubr.msk.f32.vlgmr.msra.gmra.mxu1 %vm679_vm2, %v1019_v12 }
 0x3cd   : > { %2013 = vmatprep.mubr.msk.f32.mxu1 %vm2391_vm0, %v2390_v0  ;;  %2012 = vmatpush3.msra.mxu1 %v1329_v13 }
 0x3ce   : > { %2021 = vmatprep.subr.mxu1 %v2390_v0 }
 0x41d   : > { %v1096_v15 = vpop.f32.mrf.mxu0 }
 0x41e   : > { %2009 = vmatmul.mubr.msk.f32.vlgmr.msra.gmra.mxu0 %vm679_vm2, %v1096_v15 }
 0x41f   : > { %v1990_v16 = vpop.f32.mrf.mxu0  ;;  %2017 = vmatpush3.msra.mxu0 %v1330_v14  ;;  %2018 = vmatprep.mubr.msk.f32.mxu0 %vm2391_vm0, %v2390_v0 }
 0x485   : > { %v1172_v18 = vpop.f32.mrf.mxu1 }
 0x486   : > { %2014 = vmatmul.mubr.msk.f32.vlgmr.msra.gmra.mxu1 %vm679_vm2, %v1172_v18 }
 0x487   : > { %v1995_v19 = vpop.f32.mrf.mxu1  ;;  %2022 = vmatpush3.msra.mxu1 %v1331_v17  ;;  %2023 = vmatprep.mubr.msk.f32.mxu1 %vm2391_vm0, %v2390_v0 }
 0x488   : > { %v1248_v20 = vpop.f32.mrf.mxu0 }
 0x489   : > { %2019 = vmatmul.mubr.msk.f32.vlgmr.msra.gmra.mxu0 %vm679_vm2, %v1248_v20 }
 0x48a   : > { %v2000_v21 = vpop.f32.mrf.mxu0 }
 0x48c   : > { %v1324_v22 = vpop.f32.mrf.mxu1 }
 0x48d   : > { %2024 = vmatmul.mubr.msk.f32.vlgmr.msra.gmra.mxu1 %vm679_vm2, %v1324_v22 }
 0x48e   : > { %v2005_v23 = vpop.f32.mrf.mxu1 }
 0x4de   : > { %v1401_v24 = vpop.f32.mrf.mxu0 }
 0x4df   : > { %v1624_v30 = vsel %vm506_vm1, %v1401_v24, 0.0 }
 0x4e0   : > { %v2010_v25 = vpop.f32.mrf.mxu0 }
 0x546   : > { %v1474_v26 = vpop.f32.mrf.mxu1 }
 0x547   : > { %v1625_v27 = vsel %vm506_vm1, %v1474_v26, 0.0 }
 0x548   : > { %v2015_v28 = vpop.f32.mrf.mxu1  ;;  %v1626_v0 = vadd.f32 %v1625_v27, %v1624_v30 }
 0x549   : > { %v1547_v29 = vpop.f32.mrf.mxu0 }
 0x54a   : > { %v1627_v31 = vsel %vm506_vm1, %v1547_v29, 0.0 }
 0x54b   : > { %v2020_v32 = vpop.f32.mrf.mxu0  ;;  %v1628_v33 = vadd.f32 %v1627_v31, %v1626_v0 }
 0x54d   : > { %v1620_v34 = vpop.f32.mrf.mxu1 }
 0x54e   : > { %v1629_v35 = vsel %vm506_vm1, %v1620_v34, 0.0 }
 0x54f   : > { %v1630_v37 = vadd.f32 %v1629_v35, %v1628_v33  ;;  %v2025_v38 = vpop.f32.mrf.mxu1 }
 0x551   : > { %v1638_v39 = vadd.f32 %v1899_v36, %v1630_v37 }
 0x553   : > { %v1639_v40 = vadd.f32 %v1638_v39, %v2659_v10 }
 0x555   : > { %v1640_v41 = vsel %vm506_vm1, %v1639_v40, 0.0  ;;  %v1645_v42 = vmul.f32 %v1639_v40, %v1639_v40 }
 0x556   : > { %1641 = vadd.xlane.f32.xlu0 %v1640_v41 }
 0x557   : > { %v1646_v43 = vsel %vm506_vm1, %v1645_v42, 0.0 }
 0x558   : > { %1647 = vadd.xlane.f32.xlu1 %v1646_v43 }
 0x559   : > { %2288 = shalt.err (!%p2285_p8)
}
 0x55a   : > { %s2289_s19 = scalar_lea.hbm %s2770_s23, 512  ;;  %s2293_s28 = scalar_lea.hbm %s2851_s11, 1024 }
 0x55b   : > { %p2290_p10 = scmp.ne.s32.totalorder %s2770_s23, %s2289_s19  ;;  %p2294_p2 = scmp.lt.s32.totalorder %s2770_s23, %s2851_s11 }
 0x55c   : > { %p2295_p4 = scmp.lt.s32.totalorder %s2293_s28, %s2289_s19 }
 0x55d   : > { %p2291_p1 = pnand %p2290_p10, %p2885_p0 }
 0x55e   : > { %p2296_p6 = por %p2295_p4, %p2294_p2 }
 0x55f   : > { %p2292_p11 = pneg %p2291_p1 }
 0x561   : > { %p2297_p12 = pnand %p2296_p6, %p2292_p11 }
 0x563   : > { %2300 = shalt.err (!%p2297_p12)
}
 0x564   : > { %s2397_s29 = smov 128   ;;  %s2398_s25 = smov 8   ;;  %v1900_v52 = vld [vmem:[%s2848_s8] ss:$0 sm:$0xff] }
 0x565   : > { %2043 = dma.vmem_to_hbm [thread:$0]  (%p2885_p0), %s2772_s2, 512, %s2770_s23, %s1679_s30, %s2397_s29, %s2397_s29, %s2398_s25  }
 0x566   : > { %v1901_v54 = vld [vmem:[%s2849_s9] ss:$0 sm:$0xff]  ;;  %s1904_s2 = sshll.u32 %s2481_s21, 7  ;;  %s485_s23 = scalar_lea.vmem [#allocation11], %s2623_s24 }
 0x567   : > { %s1692_s30 = sshll.u32 %s485_s23, 4  ;;  %s1690_s13 = scalar_lea.hbm %s2850_s10, %s1904_s2  ;;  %s1693_s30 = int_to_ptr.vmem [resolvable:$true] %s1692_s30 }
 0x568   : > { %s1674_s26 = scalar_lea.sflag [#allocation4], %s2620_s17  ;;  %s2301_s28 = scalar_lea.vmem %s1693_s30, 128 }
 0x569   : > { %p2302_p5 = scmp.ne.s32.totalorder %s1693_s30, %s2301_s28  ;;  %s2399_s15 = smov [#allocation11]  }
 0x56a   : > { %s2305_s16 = sshll.u32 %s2399_s15, 4  ;;  %s2306_s16 = int_to_ptr.vmem [resolvable:$false] %s2305_s16 }
 0x56b   : > { %p2303_p3 = pnand %p2302_p5, %p2885_p0  ;;  %s2307_s21 = scalar_lea.vmem %s2306_s16, 256 }
 0x56c   : > { %p2308_p9 = scmp.lt.s32.totalorder %s1693_s30, %s2306_s16  ;;  %p2309_p13 = scmp.lt.s32.totalorder %s2307_s21, %s2301_s28 }
 0x56d   : > { %p2304_p7 = pneg %p2303_p3 }
 0x56e   : > { %p2310_p8 = por %p2309_p13, %p2308_p9 }
 0x570   : > { %p2311_p10 = pnand %p2310_p8, %p2304_p7 }
 0x5df   : > { %v1642_v10 = vpop.xlane.xlu0 %1641 }
 0x5e0   : > { %v1644_v44 = vmul.f32 0.03125, %v1642_v10 }
 0x5e1   : > { %v1648_v45 = vpop.xlane.xlu1 %1647 }
 0x5e2   : > { %v1650_v46 = vmul.f32 %v1644_v44, %v1644_v44  ;;  %v1649_v47 = vmul.f32 0.03125, %v1648_v45  ;;  %v1652_v50 = vsub.f32 %v1639_v40, %v1644_v44 }
 0x5e4   : > { %v1651_v48 = vsub.f32 %v1649_v47, %v1650_v46 }
 0x5e6   : > { %v1653_v49 = vadd.f32 1e-05, %v1651_v48 }
 0x5e8   : > { %2139 = vrsqrt.f32 %v1653_v49 }
 0x5f5   : > { %v2140_v51 = vpop.eup %2139 }
 0x5f6   : > { %v1655_v53 = vmul.f32 %v2140_v51, %v1652_v50 }
 0x5f8   : > { %v1663_v55 = vmul.f32 %v1900_v52, %v1655_v53 }
 0x5fa   : > { %v1671_v56 = vadd.f32 %v1901_v54, %v1663_v55 }
 0x5fc   : > { %1672 = vst.msk [vmem:[%s485_s23] sm:$0xff] %vm506_vm1, %v1671_v56 }
 0x5fd   : > { %2314 = shalt.err (!%p2311_p10)
}
 0x5fe   : > { %s2315_s24 = scalar_lea.hbm %s1690_s13, 128  ;;  %s2319_s25 = scalar_lea.hbm %s2850_s10, 256 }
 0x5ff   : > { %p2316_p1 = scmp.ne.s32.totalorder %s1690_s13, %s2315_s24  ;;  %p2320_p4 = scmp.lt.s32.totalorder %s1690_s13, %s2850_s10 }
 0x600   : > { %p2321_p6 = scmp.lt.s32.totalorder %s2319_s25, %s2315_s24 }
 0x601   : > { %p2317_p11 = pnand %p2316_p1, %p2885_p0 }
 0x602   : > { %p2322_p12 = por %p2321_p6, %p2320_p4 }
 0x603   : > { %p2318_p2 = pneg %p2317_p11 }
 0x605   : > { %p2323_p5 = pnand %p2322_p12, %p2318_p2 }
 0x607   : > { %2326 = shalt.err (!%p2323_p5)
}
 0x608   : > { %2042 = dma.vmem_to_hbm [thread:$0]  (%p2885_p0), %s1693_s30, 128, %s1690_s13, %s1674_s26  }
 0x609 PF: > { %s2886_s4 = sld [smem:[#allocation20_spill]]  ;;  %p2889_p7 = scmp.ge.s32.totalorder %s2381_s20, 2 }
 0x60a   : > { %s2887_s6 = sld [smem:[#allocation22_spill]] }
 0x60f   : > { %s1720_s2 = sand.u32 1, %s2886_s4  }
 0x610   : > { %p2888_p3 = scmp.ne.s32.totalorder %s2887_s6, 0  ;;  %s1721_s23 = scalar_lea.sflag [#allocation4], %s1720_s2 }
 0x612   : > { %p2064_p9 = pnand %p2889_p7, %p2888_p3 }
 0x614   : > { %p2065_p13 = pneg %p2064_p9 }
 0x616   : > { %2360 = dma.done.wait (%p2065_p13), %s1721_s23, 128  }
 0x617   : > { %2362 = vsyncadd (%p2065_p13), %s1721_s23, 4294967168  ;;  %s1730_s27 = scalar_lea.sflag [#allocation13], %s1720_s2 }
 0x618   : > { %2364 = dma.done.wait (%p2065_p13), %s1730_s27, 512  }
 0x619   : > { %2366 = vsyncadd (%p2065_p13), %s1730_s27, 4294966784  ;;  %s2890_s20 = sld [smem:[#allocation23_spill]]  ;;  %s2893_s17 = smov %s2373_s18 }
 0x61a   : > { %s2891_s19 = sld [smem:[#allocation21_spill]] }
 0x61b   : > { %s2892_s14 = sld [smem:[#allocation24_spill]] }
 0x61f   : > { %p32_p0 = scmp.ge.s32.totalorder %s2890_s20, 4  }
 0x620   : > { %s2894_s18 = smov %s2891_s19 }
 0x621   : > { %s2895_s19 = smov %s2892_s14  ;;  %34 = sbr.rel (!%p32_p0) target bundleno = 14 (0xe), region = 147 }
 0x626   :  { %1735 = vsyncpa [#allocation3], 1 }
 0x627   :  { %1737 = vsyncpa [#allocation3 + $0x1], 1 }
 0x628   :  { %1738 = vsyncpa [#allocation6], 1 }
 0x629   :  { %1740 = vsyncpa [#allocation6 + $0x1], 1 }
 0x62a   :  { %1741 = vsyncpa [#allocation9], 1 }
 0x62b   :  { %1742 = vsyncpa [#allocation4], 1 }
 0x62c   :  { %1744 = vsyncpa [#allocation4 + $0x1], 1 }
 0x62d   :  { %1745 = vsyncpa [#allocation13], 1 }
 0x62e   :  { %1747 = vsyncpa [#allocation13 + $0x1], 1 }

</bundles_post_ra>
